<compile_context>
chip_gen: v7x
topology: tpu7x:2x2x1
jax: 0.10.0
libtpu: 0.0.40
codegen_flags: <defaults>
</compile_context>

<pallas_src>
from functools import partial

import jax
import jax.numpy as jnp
import numpy as np
from jax.experimental import pallas as pl
from jax.experimental.pallas import tpu as pltpu


# ------------------------- fused forward kernel (1 launch) -------------------------

def _make_fused_kernel(n_batch, l2):
    """Kernel: f = relu(X @ Wpre + bpre); out[n] = (wf2 · f_nᵀ) + bf2  (channel-first)."""

    def kernel(x_ref, wpre_ref, bpre_ref, wf2_ref, bf2_ref, o_ref):
        # x_ref: (N*L2, KX) — whole (tiny) problem in one grid step.
        f = jnp.dot(x_ref[...], wpre_ref[...],
                    preferred_element_type=jnp.float32)          # (N*L2, hidden_ff)
        f = jnp.maximum(f + bpre_ref[...], 0.0)                  # fused bias + ReLU
        # fc2 evaluated in transposed form so the store is already (out_dim, L2):
        # out_T[o, l2] = sum_r wf2[o, r] * f_n[l2, r]  -> no in/after-kernel transpose.
        for n in range(n_batch):                                  # static unroll (N tiny)
            f_n = f[n * l2:(n + 1) * l2, :]                       # sublane slice, (L2, hidden_ff)
            out_t = jax.lax.dot_general(
                wf2_ref[...], f_n,
                dimension_numbers=(((1,), (1,)), ((), ())),
                preferred_element_type=jnp.float32)               # (out_dim, L2)
            o_ref[n] = (out_t + bf2_ref[...]).astype(o_ref.dtype)

    return kernel


def convnet1d_forward(x, pp, *, k1, k2):
    """x: (N, dim, L) float32 (PyTorch Conv1d layout) -> (N, out_dim, L2)."""
    N, C, L = x.shape
    L1 = (L - k1) // k1 + 1
    L2 = (L1 - k2) // k2 + 1
    Lu = L2 * k2 * k1                       # input positions actually consumed
    KX = k2 * k1 * C
    M = N * L2
    hidden_ff = pp["wpre"].shape[1]
    out_dim = pp["wf2"].shape[0]

    # stride == kernel for both convs -> "im2col" is just channels-last + reshape.
    # This is the single remaining wrapper-side HLO; allow_input_fusion folds it
    # into the pallas_call operand.
    X = jnp.transpose(x, (0, 2, 1))[:, :Lu, :].reshape(M, KX)

    def _full(a):                            # resident full-array block
        return pl.BlockSpec(a.shape, lambda i: (0,) * a.ndim)

    flops = 2 * M * KX * hidden_ff + 2 * M * hidden_ff * out_dim
    bytes_accessed = 4 * (M * KX + KX * hidden_ff + hidden_ff
                          + out_dim * hidden_ff + out_dim + N * out_dim * L2)

    out = pl.pallas_call(
        _make_fused_kernel(N, L2),
        out_shape=jax.ShapeDtypeStruct((N, out_dim, L2), x.dtype),
        grid=(1,),                                            # single step: launch-bound kernel
        in_specs=[
            pl.BlockSpec((M, KX), lambda i: (0, 0)),
            _full(pp["wpre"]), _full(pp["bpre"]),
            _full(pp["wf2"]), _full(pp["bf2"]),
        ],
        out_specs=pl.BlockSpec((N, out_dim, L2), lambda i: (0, 0, 0)),
        compiler_params=pltpu.CompilerParams(
            dimension_semantics=("arbitrary",),               # no 2-TC split of a 2-elem batch
            allow_input_fusion=[True, False, False, False, False],
        ),
        cost_estimate=pl.CostEstimate(flops=flops, transcendentals=0,
                                      bytes_accessed=bytes_accessed),
    )(X, pp["wpre"], pp["bpre"], pp["wf2"], pp["bf2"])

    return out                                                 # already (N, out_dim, L2)


# ----------------------- parameters (PyTorch layout) + offline prep -----------------------

def init_torch_layout_params(key, dim, hidden_dim, out_dim, hidden_ff, k1, k2):
    ks = jax.random.split(key, 8)

    def _u(k, fan_in, shape):
        bound = 1.0 / np.sqrt(fan_in)
        return jax.random.uniform(k, shape, jnp.float32, -bound, bound)

    return dict(
        w1=_u(ks[0], dim * k1, (hidden_dim, dim, k1)),          # Conv1d weight (O, I, K)
        b1=_u(ks[1], dim * k1, (hidden_dim,)),
        w2=_u(ks[2], hidden_dim * k2, (out_dim, hidden_dim, k2)),
        b2=_u(ks[3], hidden_dim * k2, (out_dim,)),
        wf1=_u(ks[4], out_dim, (hidden_ff, out_dim)),           # Linear weight (out, in)
        bf1=_u(ks[5], out_dim, (hidden_ff,)),
        wf2=_u(ks[6], hidden_ff, (out_dim, hidden_ff)),
        bf2=_u(ks[7], hidden_ff, (out_dim,)),
    )


def prep_params(tp, *, k1, k2):
    """Offline (host, float64) composition of conv1 ∘ conv2 ∘ fc1 into one affine map.

    Valid because the PyTorch module applies NO nonlinearity between conv1, conv2
    and fc1 (ReLU only follows fc1).  Runs once outside jit: zero runtime cost.
    """
    w1 = np.asarray(tp["w1"], np.float64)    # (hidden, dim, k1)
    b1 = np.asarray(tp["b1"], np.float64)
    w2 = np.asarray(tp["w2"], np.float64)    # (out_dim, hidden, k2)
    b2 = np.asarray(tp["b2"], np.float64)
    wf1 = np.asarray(tp["wf1"], np.float64)  # (hidden_ff, out_dim)
    bf1 = np.asarray(tp["bf1"], np.float64)
    wf2 = np.asarray(tp["wf2"], np.float64)  # (out_dim, hidden_ff)
    bf2 = np.asarray(tp["bf2"], np.float64)

    hidden, dim, _ = w1.shape
    # conv1 as GEMM whose rows match the channels-last stride==kernel patch order,
    # block-diagonalised over the k2 window consumed by conv2.
    w1_mat = np.transpose(w1, (2, 1, 0)).reshape(k1 * dim, hidden)       # rows (k1, c)
    w1_bd = np.kron(np.eye(k2), w1_mat)                                  # (k2*k1*dim, k2*hidden)
    b1_full = np.tile(b1, k2)                                            # (k2*hidden,)
    # conv2 as GEMM with rows in (k2, hidden) order.
    w2_mat = np.transpose(w2, (2, 1, 0)).reshape(k2 * hidden, w2.shape[0])
    # window -> hidden_ff pre-ReLU affine map.
    wpre = w1_bd @ w2_mat @ wf1.T                                        # (KX, hidden_ff)
    bpre = (b1_full @ w2_mat + b2) @ wf1.T + bf1                         # (hidden_ff,)

    return dict(
        wpre=jnp.asarray(wpre, dtype=jnp.float32),
        bpre=jnp.asarray(bpre.reshape(1, -1), dtype=jnp.float32),
        wf2=jnp.asarray(wf2, dtype=jnp.float32),                  # (out_dim, hidden_ff): A·Bᵀ GEMM
        bf2=jnp.asarray(bf2.reshape(-1, 1), dtype=jnp.float32),   # (out_dim, 1): lane-broadcast bias
    )


# ----------------------------- pure-JAX reference -----------------------------

def reference_forward(x, tp, *, k1, k2):
    hp = jax.lax.Precision.HIGHEST
    out = jax.lax.conv_general_dilated(
        x, tp["w1"], window_strides=(k1,), padding="VALID",
        dimension_numbers=("NCH", "OIH", "NCH"), precision=hp)
    out = out + tp["b1"][None, :, None]
    out = jax.lax.conv_general_dilated(
        out, tp["w2"], window_strides=(k2,), padding="VALID",
        dimension_numbers=("NCH", "OIH", "NCH"), precision=hp)
    out = out + tp["b2"][None, :, None]
    out = jnp.transpose(out, (0, 2, 1))
    out = jnp.maximum(jnp.matmul(out, tp["wf1"].T, precision=hp) + tp["bf1"], 0.0)
    out = jnp.matmul(out, tp["wf2"].T, precision=hp) + tp["bf2"]
    return jnp.transpose(out, (0, 2, 1))


# ------------------------------------ main ------------------------------------

if __name__ == "__main__":
    DIM, HIDDEN_DIM, OUT_DIM, HIDDEN_FF = 4, 32, 32, 256
    DATA_SHAPE1, N_PATCH = 256, 32
    k1 = int(DATA_SHAPE1 / N_PATCH / 2)                  # 4  (kernel == stride)
    k2_cand = int(DATA_SHAPE1 / N_PATCH / 4)              # 2
    k2 = k2_cand if k2_cand > 1 else k1                   # module's constructor branch

    N, L = 2, DATA_SHAPE1                                  # input (2, 4, 256)

    key = jax.random.PRNGKey(0)
    kx, kp = jax.random.split(key)
    x = jax.random.normal(kx, (N, DIM, L), jnp.float32)
    torch_params = init_torch_layout_params(kp, DIM, HIDDEN_DIM, OUT_DIM, HIDDEN_FF, k1, k2)
    pp = prep_params(torch_params, k1=k1, k2=k2)           # offline, outside jit

    fwd = jax.jit(partial(convnet1d_forward, k1=k1, k2=k2))
    out = jax.block_until_ready(fwd(x, pp))

    L1 = (L - k1) // k1 + 1
    L2 = (L1 - k2) // k2 + 1
    assert out.shape == (N, OUT_DIM, L2), out.shape

    ref = reference_forward(x, torch_params, k1=k1, k2=k2)
    np.testing.assert_allclose(np.asarray(out), np.asarray(ref), rtol=1e-3, atol=1e-3)

    print("KERNEL_OK")
</pallas_src>

<mosaic_0001>
module attributes {stable_mosaic.version = 11 : i64} {
  func.func @kernel(%arg0: i32, %arg1: memref<64x32xf32, #tpu.memory_space<vmem>>, %arg2: memref<32x256xf32, #tpu.memory_space<vmem>>, %arg3: memref<1x256xf32, #tpu.memory_space<vmem>>, %arg4: memref<32x256xf32, #tpu.memory_space<vmem>>, %arg5: memref<32x1xf32, #tpu.memory_space<vmem>>, %arg6: memref<2x32x32xf32, #tpu.memory_space<vmem>>) attributes {dimension_semantics = [#tpu.dimension_semantics<arbitrary>], iteration_bounds = array<i64: 1>, scalar_prefetch = 0 : i64, scratch_operands = 0 : i64, tpu.core_type = #tpu.core_type<tc>, window_params = [{pipeline_mode = #tpu.pipeline_mode<synchronous>, transform_indices = @transform_0, window_bounds = array<i64: 64, 32>}, {pipeline_mode = #tpu.pipeline_mode<synchronous>, transform_indices = @transform_1, window_bounds = array<i64: 32, 256>}, {pipeline_mode = #tpu.pipeline_mode<synchronous>, transform_indices = @transform_2, window_bounds = array<i64: 1, 256>}, {pipeline_mode = #tpu.pipeline_mode<synchronous>, transform_indices = @transform_3, window_bounds = array<i64: 32, 256>}, {pipeline_mode = #tpu.pipeline_mode<synchronous>, transform_indices = @transform_4, window_bounds = array<i64: 32, 1>}, {pipeline_mode = #tpu.pipeline_mode<synchronous>, transform_indices = @transform_5, window_bounds = array<i64: 2, 32, 32>}]} {
    %c0 = arith.constant 0 : index
    %c0_0 = arith.constant 0 : index
    %0 = vector.load %arg1[%c0, %c0_0] : memref<64x32xf32, #tpu.memory_space<vmem>>, vector<64x32xf32>
    %c0_1 = arith.constant 0 : index
    %c0_2 = arith.constant 0 : index
    %1 = vector.load %arg2[%c0_1, %c0_2] : memref<32x256xf32, #tpu.memory_space<vmem>>, vector<32x256xf32>
    %cst = arith.constant dense<0.000000e+00> : vector<64x256xf32>
    %2 = tpu.matmul %0, %1, %cst {dimension_numbers = #tpu.dot_dimension_numbers<[1], [0], [0], [1], [0, 0, 1, 1], [], []>} : vector<64x32xf32>, vector<32x256xf32>, vector<64x256xf32> -> vector<64x256xf32>
    %c0_3 = arith.constant 0 : index
    %c0_4 = arith.constant 0 : index
    %3 = vector.load %arg3[%c0_3, %c0_4] : memref<1x256xf32, #tpu.memory_space<vmem>>, vector<1x256xf32>
    %4 = vector.broadcast %3 : vector<1x256xf32> to vector<64x256xf32>
    %5 = arith.addf %2, %4 : vector<64x256xf32>
    %cst_5 = arith.constant 0.000000e+00 : f32
    %6 = vector.broadcast %cst_5 : f32 to vector<64x256xf32>
    %7 = arith.maximumf %5, %6 : vector<64x256xf32>
    %8 = vector.extract_strided_slice %7 {offsets = [0, 0], sizes = [32, 256], strides = [1, 1]} : vector<64x256xf32> to vector<32x256xf32>
    %c0_6 = arith.constant 0 : index
    %c0_7 = arith.constant 0 : index
    %9 = vector.load %arg4[%c0_6, %c0_7] : memref<32x256xf32, #tpu.memory_space<vmem>>, vector<32x256xf32>
    %cst_8 = arith.constant dense<0.000000e+00> : vector<32x32xf32>
    %10 = tpu.matmul %9, %8, %cst_8 {dimension_numbers = #tpu.dot_dimension_numbers<[1], [1], [0], [0], [0, 0, 1, 0], [], []>} : vector<32x256xf32>, vector<32x256xf32>, vector<32x32xf32> -> vector<32x32xf32>
    %c0_9 = arith.constant 0 : index
    %c0_10 = arith.constant 0 : index
    %11 = vector.load %arg5[%c0_9, %c0_10] : memref<32x1xf32, #tpu.memory_space<vmem>>, vector<32x1xf32>
    %12 = vector.broadcast %11 : vector<32x1xf32> to vector<32x32xf32>
    %13 = arith.addf %10, %12 : vector<32x32xf32>
    %c0_11 = arith.constant 0 : index
    %c0_12 = arith.constant 0 : index
    %c0_13 = arith.constant 0 : index
    %14 = vector.load %arg6[%c0_11, %c0_12, %c0_13] : memref<2x32x32xf32, #tpu.memory_space<vmem>>, vector<1x32x32xf32>
    %15 = vector.shape_cast %14 : vector<1x32x32xf32> to vector<32x32xf32>
    %16 = vector.shape_cast %13 : vector<32x32xf32> to vector<1x32x32xf32>
    tpu.vector_store %arg6[%c0_11, %c0_12, %c0_13], %16 {strides = array<i32>} : memref<2x32x32xf32, #tpu.memory_space<vmem>>, vector<1x32x32xf32>,
    %17 = vector.extract_strided_slice %7 {offsets = [32, 0], sizes = [32, 256], strides = [1, 1]} : vector<64x256xf32> to vector<32x256xf32>
    %c0_14 = arith.constant 0 : index
    %c0_15 = arith.constant 0 : index
    %18 = vector.load %arg4[%c0_14, %c0_15] : memref<32x256xf32, #tpu.memory_space<vmem>>, vector<32x256xf32>
    %cst_16 = arith.constant dense<0.000000e+00> : vector<32x32xf32>
    %19 = tpu.matmul %18, %17, %cst_16 {dimension_numbers = #tpu.dot_dimension_numbers<[1], [1], [0], [0], [0, 0, 1, 0], [], []>} : vector<32x256xf32>, vector<32x256xf32>, vector<32x32xf32> -> vector<32x32xf32>
    %c0_17 = arith.constant 0 : index
    %c0_18 = arith.constant 0 : index
    %20 = vector.load %arg5[%c0_17, %c0_18] : memref<32x1xf32, #tpu.memory_space<vmem>>, vector<32x1xf32>
    %21 = vector.broadcast %20 : vector<32x1xf32> to vector<32x32xf32>
    %22 = arith.addf %19, %21 : vector<32x32xf32>
    %c1 = arith.constant 1 : index
    %c0_19 = arith.constant 0 : index
    %c0_20 = arith.constant 0 : index
    %23 = vector.load %arg6[%c1, %c0_19, %c0_20] : memref<2x32x32xf32, #tpu.memory_space<vmem>>, vector<1x32x32xf32>
    %24 = vector.shape_cast %23 : vector<1x32x32xf32> to vector<32x32xf32>
    %25 = vector.shape_cast %22 : vector<32x32xf32> to vector<1x32x32xf32>
    tpu.vector_store %arg6[%c1, %c0_19, %c0_20], %25 {strides = array<i32>} : memref<2x32x32xf32, #tpu.memory_space<vmem>>, vector<1x32x32xf32>,
    return
  }
  func.func @transform_0(%arg0: i32) -> (i32, i32) {
    %c0_i32 = arith.constant 0 : i32
    %c0_i32_0 = arith.constant 0 : i32
    %c0_i32_1 = arith.constant 0 : i32
    return %c0_i32, %c0_i32_0 : i32, i32
  }
  func.func @transform_1(%arg0: i32) -> (i32, i32) {
    %c0_i32 = arith.constant 0 : i32
    %c0_i32_0 = arith.constant 0 : i32
    %c0_i32_1 = arith.constant 0 : i32
    return %c0_i32, %c0_i32_0 : i32, i32
  }
  func.func @transform_2(%arg0: i32) -> (i32, i32) {
    %c0_i32 = arith.constant 0 : i32
    %c0_i32_0 = arith.constant 0 : i32
    %c0_i32_1 = arith.constant 0 : i32
    return %c0_i32, %c0_i32_0 : i32, i32
  }
  func.func @transform_3(%arg0: i32) -> (i32, i32) {
    %c0_i32 = arith.constant 0 : i32
    %c0_i32_0 = arith.constant 0 : i32
    %c0_i32_1 = arith.constant 0 : i32
    return %c0_i32, %c0_i32_0 : i32, i32
  }
  func.func @transform_4(%arg0: i32) -> (i32, i32) {
    %c0_i32 = arith.constant 0 : i32
    %c0_i32_0 = arith.constant 0 : i32
    %c0_i32_1 = arith.constant 0 : i32
    return %c0_i32, %c0_i32_0 : i32, i32
  }
  func.func @transform_5(%arg0: i32) -> (i32, i32, i32) {
    %c0_i32 = arith.constant 0 : i32
    %c0_i32_0 = arith.constant 0 : i32
    %c0_i32_1 = arith.constant 0 : i32
    %c0_i32_2 = arith.constant 0 : i32
    return %c0_i32, %c0_i32_0, %c0_i32_1 : i32, i32, i32
  }
}

</mosaic_0001>

<bundles_post_ra>
// kernel: convnet1d_forward.1
= control target key start
LH: loop header
LB: loop body
LE: loop exit
PB: predicated region body
PF: predicated region fallthrough
CT: control target
= control target key end

     0   :  { %v529_v7 = vmov 0.0   ;;  %s679_s0 = inlined_call_operand.vmem [shape: f32[64,32], index: 0, kind: input, shape index: {}]   ;;  %s680_s1 = inlined_call_operand.vmem [shape: f32[32,256], index: 1, kind: input, shape index: {}]   ;;  %s681_s2 = inlined_call_operand.vmem [shape: f32[1,256], index: 2, kind: input, shape index: {}]   ;;  %s682_s3 = inlined_call_operand.vmem [shape: f32[32,256], index: 3, kind: input, shape index: {}]   ;;  %s683_s4 = inlined_call_operand.vmem [shape: f32[32,1], index: 4, kind: input, shape index: {}]   ;;  %s684_s5 = inlined_call_operand.hbm [shape: f32[2,32,32], index: 5, kind: output, shape index: {}]  }
   0x1   :  { %v30_v0 = vld [vmem:[%s680_s1 + $0x8] sm:$0xff]  ;;  %v32_v1 = vld [vmem:[%s680_s1 + $0x18] sm:$0xff]  ;;  %v29_v2 = vld [vmem:[%s680_s1] sm:$0xff]  ;;  %138 = vmatprep.mubr.f32.mxu0 %v529_v7 }
   0x2   :  { %v470_v3 = vpack.c.bf16 %v32_v1, %v30_v0  ;;  %v31_v4 = vld [vmem:[%s680_s1 + $0x10] sm:$0xff]  ;;  %v34_v5 = vld [vmem:[%s680_s1 + $0x28] sm:$0xff]  ;;  %v36_v6 = vld [vmem:[%s680_s1 + $0x38] sm:$0xff] }
   0x3   :  { %v472_v8 = vpack.c.bf16 %v31_v4, %v29_v2  ;;  %v474_v9 = vpack.c.bf16 %v36_v6, %v34_v5  ;;  %v33_v10 = vld [vmem:[%s680_s1 + $0x20] sm:$0xff]  ;;  %v35_v11 = vld [vmem:[%s680_s1 + $0x30] sm:$0xff] }
   0x4   :  { %471 = vmatprep.subr.bf16.mxu0 %v470_v3  ;;  %v476_v12 = vpack.c.bf16 %v35_v11, %v33_v10 }
   0x5   :  { %473 = vmatpush1.bf16.msra.mxu0 %v472_v8 }
   0x6   :  { %475 = vmatprep.subr.bf16.mxu0 %v474_v9 }
   0x7   :  { %10 = vsyncpa [#allocation3], 0  ;;  %v21_v13 = vld [vmem:[%s679_s0] sm:$0xff]  ;;  %vm49_vm0 = vcmask 261120   ;;  %v22_v14 = vld [vmem:[%s679_s0 + $0x8] sm:$0xff]  ;;  %v530_v24 = vmov 0   ;;  %v39_v27 = vlaneseq }
   0x8   :  { %v23_v15 = vld [vmem:[%s679_s0 + $0x10] sm:$0xff]  ;;  %v24_v16 = vld [vmem:[%s679_s0 + $0x18] sm:$0xff]  ;;  %v25_v17 = vld [vmem:[%s679_s0 + $0x20] sm:$0xff]  ;;  %504 = vset.pattern.permute.xlu1 %v530_v24  ;;  %503 = vset.pattern.permute.xlu0 %v530_v24 }
   0x9   :  { %477 = vmatpush1.bf16.msra.mxu0 %v476_v12  ;;  %v26_v18 = vld [vmem:[%s679_s0 + $0x28] sm:$0xff]  ;;  %v27_v19 = vld [vmem:[%s679_s0 + $0x30] sm:$0xff]  ;;  %v28_v20 = vld [vmem:[%s679_s0 + $0x38] sm:$0xff]  ;;  %v40_v28 = vshrl.u32 %v39_v27, 7 }
   0xa   :  { %v204_v21 = vld [vmem:[%s682_s3 + $0x8] sm:$0xff]  ;;  %v213_v22 = vld [vmem:[%s683_s4 + $0x10] sm:$0xff]  ;;  %v211_v23 = vld [vmem:[%s683_s4] sm:$0xff] }
   0xb   :  { %299 = vmatprep.mubr.f32.mxu1 %v204_v21  ;;  %227 = vperm.xlu1 %504, %v213_v22   ;;  %v214_v25 = vld [vmem:[%s683_s4 + $0x18] sm:$0xff]  ;;  %v212_v26 = vld [vmem:[%s683_s4 + $0x8] sm:$0xff]  ;;  %v41_v29 = vsub.s32 0, %v40_v28  ;;  %v37_v30 = vld [vmem:[%s681_s2] sm:$0x3]  ;;  %v45_v31 = vsub.s32 1, %v40_v28 }
   0xc   :  { %462 = vmatmul.mubr.msk.f32.vlgmr.msra.gmra.mrb[0].mxu0 %vm49_vm0, %v21_v13  ;;  %217 = vperm.xlu0 %503, %v211_v23   ;;  %v203_v13 = vld [vmem:[%s682_s3] sm:$0xff] }
   0xd   :  { %144 = vmatprep.mubr.f32.mxu0 %v529_v7  ;;  %v42_v32 = vrot.slane %v37_v30, %v41_v29  ;;  %v46_v34 = vrot.slane %v37_v30, %v45_v31  ;;  %v207_v29 = vld [vmem:[%s682_s3 + $0x20] sm:$0xff]  ;;  %v210_v31 = vld [vmem:[%s682_s3 + $0x38] sm:$0xff] }
   0xf   :  { %232 = vperm.xlu1 %504, %v214_v25  }
  0x10   :  { %463 = vmatmul.mubr.msk.f32.gmra.mrb[2].mxu0 %vm49_vm0, %v22_v14  ;;  %222 = vperm.xlu0 %503, %v212_v26  }
  0x11   :  { %150 = vmatprep.mubr.f32.mxu0 %v529_v7 }
  0x13   :  { %343 = vperm.xlu1 %504, %v212_v26  }
  0x14   :  { %464 = vmatmul.mubr.msk.f32.gmra.mrb[4].mxu0 %vm49_vm0, %v23_v15  ;;  %338 = vperm.xlu0 %503, %v211_v23   ;;  %v208_v23 = vld [vmem:[%s682_s3 + $0x28] sm:$0xff] }
  0x15   :  { %156 = vmatprep.mubr.f32.mxu0 %v529_v7 }
  0x17   :  { %353 = vperm.xlu1 %504, %v214_v25  }
  0x18   :  { %465 = vmatmul.mubr.msk.f32.gmra.mrb[6].mxu0 %vm49_vm0, %v24_v16  ;;  %348 = vperm.xlu0 %503, %v213_v22   ;;  %v206_v16 = vld [vmem:[%s682_s3 + $0x18] sm:$0xff] }
  0x19   :  { %162 = vmatprep.mubr.f32.mxu0 %v529_v7 }
  0x1c   :  { %466 = vmatmul.mubr.msk.f32.gmra.mrb[8].mxu0 %vm49_vm0, %v25_v17 }
  0x1d   :  { %168 = vmatprep.mubr.f32.mxu0 %v529_v7 }
  0x20   :  { %467 = vmatmul.mubr.msk.f32.gmra.mrb[10].mxu0 %vm49_vm0, %v26_v18 }
  0x21   :  { %174 = vmatprep.mubr.f32.mxu0 %v529_v7 }
  0x24   :  { %468 = vmatmul.mubr.msk.f32.gmra.mrb[12].mxu0 %vm49_vm0, %v27_v19 }
  0x25   :  { %180 = vmatprep.mubr.f32.mxu0 %v529_v7 }
  0x28   :  { %469 = vmatmul.mubr.msk.f32.gmra.mrb[14].mxu0 %vm49_vm0, %v28_v20 }
  0x29   :  { %420 = vmatprep.mubr.f32.mxu0 %v204_v21  ;;  %v205_v21 = vld [vmem:[%s682_s3 + $0x10] sm:$0xff] }
  0xdf   :  { %v140_v33 = vpop.f32.mrb[0].mxu0 }
  0xe0   :  { %v142_v35 = vpop.f32.mrb[1].mxu0  ;;  %v141_v36 = vadd.f32 %v140_v33, %v42_v32  ;;  %v218_v33 = vpop.permute.xlu0 %217 }
  0xe1   :  { %v143_v37 = vadd.f32 %v142_v35, %v46_v34 }
  0xe2   :  { %v187_v42 = vmax.f32 %v141_v36, 0.0 }
  0xe3   :  { %v146_v38 = vpop.f32.mrb[2].mxu0  ;;  %v188_v44 = vmax.f32 %v143_v37, 0.0 }
  0xe4   :  { %v147_v39 = vadd.f32 %v146_v38, %v42_v32  ;;  %v148_v40 = vpop.f32.mrb[3].mxu0  ;;  %v223_v37 = vpop.permute.xlu0 %222 }
  0xe5   :  { %v149_v41 = vadd.f32 %v148_v40, %v46_v34  ;;  %v228_v38 = vpop.permute.xlu1 %227 }
  0xe6   :  { %v189_v43 = vmax.f32 %v147_v39, 0.0 }
  0xe7   :  { %v190_v45 = vmax.f32 %v149_v41, 0.0  ;;  %v152_v46 = vpop.f32.mrb[4].mxu0 }
  0xe8   :  { %v154_v47 = vpop.f32.mrb[5].mxu0  ;;  %v480_v48 = vpack.c.bf16 %v189_v43, %v187_v42  ;;  %v153_v50 = vadd.f32 %v152_v46, %v42_v32 }
  0xe9   :  { %v478_v49 = vpack.c.bf16 %v190_v45, %v188_v44  ;;  %v155_v51 = vadd.f32 %v154_v47, %v46_v34  ;;  %v233_v45 = vpop.permute.xlu1 %232 }
  0xea   :  { %v191_v56 = vmax.f32 %v153_v50, 0.0 }
  0xeb   :  { %v158_v52 = vpop.f32.mrb[6].mxu0  ;;  %479 = vmatprep.subr.bf16.mxu1 %v478_v49  ;;  %v192_v58 = vmax.f32 %v155_v51, 0.0  ;;  %v339_v49 = vpop.permute.xlu0 %338 }
  0xec   :  { %v159_v53 = vadd.f32 %v158_v52, %v42_v32  ;;  %v160_v54 = vpop.f32.mrb[7].mxu0  ;;  %481 = vmatpush1.bf16.xpose.msra.mxu1 %v480_v48 }
  0xed   :  { %v161_v55 = vadd.f32 %v160_v54, %v46_v34  ;;  %v344_v50 = vpop.permute.xlu1 %343 }
  0xee   :  { %v193_v57 = vmax.f32 %v159_v53, 0.0 }
  0xef   :  { %v194_v59 = vmax.f32 %v161_v55, 0.0  ;;  %v164_v60 = vpop.f32.mrb[8].mxu0 }
  0xf0   :  { %v484_v61 = vpack.c.bf16 %v193_v57, %v191_v56  ;;  %v166_v62 = vpop.f32.mrb[9].mxu0  ;;  %v165_v0 = vadd.f32 %v164_v60, %v42_v32  ;;  %v349_v57 = vpop.permute.xlu0 %348 }
  0xf1   :  { %v482_v63 = vpack.c.bf16 %v194_v59, %v192_v58  ;;  %v167_v1 = vadd.f32 %v166_v62, %v46_v34 }
  0xf2   :  { %v195_v6 = vmax.f32 %v165_v0, 0.0 }
  0xf3   :  { %v170_v2 = vpop.f32.mrb[10].mxu0  ;;  %483 = vmatprep.subr.bf16.mxu1 %v482_v63  ;;  %v196_v8 = vmax.f32 %v167_v1, 0.0 }
  0xf4   :  { %v171_v3 = vadd.f32 %v170_v2, %v42_v32  ;;  %v172_v4 = vpop.f32.mrb[11].mxu0  ;;  %485 = vmatpush1.bf16.xpose.msra.mxu1 %v484_v61  ;;  %v354_v61 = vpop.permute.xlu1 %353 }
  0xf5   :  { %v173_v5 = vadd.f32 %v172_v4, %v46_v34 }
  0xf6   :  { %v197_v7 = vmax.f32 %v171_v3, 0.0 }
  0xf7   :  { %v198_v9 = vmax.f32 %v173_v5, 0.0  ;;  %v176_v10 = vpop.f32.mrb[12].mxu0 }
  0xf8   :  { %v488_v11 = vpack.c.bf16 %v197_v7, %v195_v6  ;;  %v178_v12 = vpop.f32.mrb[13].mxu0  ;;  %v177_v15 = vadd.f32 %v176_v10, %v42_v32 }
  0xf9   :  { %v486_v14 = vpack.c.bf16 %v198_v9, %v196_v8  ;;  %v179_v17 = vadd.f32 %v178_v12, %v46_v34 }
  0xfa   :  { %v199_v24 = vmax.f32 %v177_v15, 0.0 }
  0xfb   :  { %v182_v18 = vpop.f32.mrb[14].mxu0  ;;  %300 = vmatmul.mubr.f32.vlgmr.msra.gmra.mrb[0].mxu1 %v203_v13  ;;  %487 = vmatprep.subr.bf16.mxu0 %v486_v14  ;;  %v200_v26 = vmax.f32 %v179_v17, 0.0 }
  0xfc   :  { %v183_v19 = vadd.f32 %v182_v18, %v42_v32  ;;  %494 = vmatprep.subr.bf16.mxu1 %v486_v14  ;;  %v184_v20 = vpop.f32.mrb[15].mxu0  ;;  %489 = vmatpush1.bf16.xpose.msra.mxu0 %v488_v11  ;;  %v209_v32 = vld [vmem:[%s682_s3 + $0x30] sm:$0xff]  ;;  %s531_s3 = smov [#allocation2]  }
  0xfd   :  { %v185_v22 = vadd.f32 %v184_v20, %v46_v34  ;;  %496 = vmatpush1.bf16.xpose.msra.mxu1 %v488_v11  ;;  %304 = vmatprep.mubr.f32.mxu1 %v206_v16  ;;  %s451_s21 = sshll.u32 %s531_s3, 4  ;;  %s452_s21 = int_to_ptr.vmem [resolvable:$true] %s451_s21 }
  0xfe   :  { %v201_v25 = vmax.f32 %v183_v19, 0.0  ;;  %s505_s22 = scalar_lea.vmem %s452_s21, 1024  ;;  %p510_p1 = scmp.lt.s32.totalorder %s452_s21, %s452_s21 }
  0xff   :  { %v202_v27 = vmax.f32 %v185_v22, 0.0  ;;  %305 = vmatmul.mubr.f32.gmra.mrb[2].mxu1 %v205_v21  ;;  %p506_p0 = scmp.ne.s32.totalorder %s452_s21, %s505_s22  ;;  %p511_p2 = scmp.lt.s32.totalorder %s505_s22, %s505_s22 }
 0x100   :  { %v492_v28 = vpack.c.bf16 %v201_v25, %v199_v24  ;;  %309 = vmatprep.mubr.f32.mxu1 %v208_v23 }
 0x101   :  { %v490_v30 = vpack.c.bf16 %v202_v27, %v200_v26  ;;  %p512_p3 = por %p511_p2, %p510_p1 }
 0x103   :  { %310 = vmatmul.mubr.f32.gmra.mrb[4].mxu1 %v207_v29  ;;  %495 = vmatprep.subr.bf16.mxu1 %v490_v30  ;;  %p513_p4 = pnand %p512_p3, %p506_p0 }
 0x104   :  { %491 = vmatprep.subr.bf16.mxu0 %v490_v30  ;;  %314 = vmatprep.mubr.f32.mxu1 %v210_v31 }
 0x105   :  { %497 = vmatpush1.bf16.xpose.msra.mxu1 %v492_v28  ;;  %493 = vmatpush1.bf16.xpose.msra.mxu0 %v492_v28 }
 0x107   :  { %315 = vmatmul.mubr.f32.gmra.mrb[6].mxu1 %v209_v32 }
 0x108   :  { %425 = vmatprep.mubr.f32.mxu1 %v206_v16 }
 0x10c   :  { %426 = vmatmul.mubr.f32.vlgmr.msra.gmra.mrb[8].mxu1 %v205_v21  ;;  %421 = vmatmul.mubr.f32.vlgmr.msra.gmra.mrb[16].mxu0 %v203_v13 }
 0x10d   :  { %430 = vmatprep.mubr.f32.mxu1 %v208_v23 }
 0x110   :  { %431 = vmatmul.mubr.f32.gmra.mrb[10].mxu1 %v207_v29 }
 0x111   :  { %435 = vmatprep.mubr.f32.mxu1 %v210_v31 }
 0x114   :  { %436 = vmatmul.mubr.f32.gmra.mrb[12].mxu1 %v209_v32 }
 0x1ce   :  { %v301_v34 = vpop.f32.mrb[0].mxu1 }
 0x1cf   :  { %v302_v35 = vadd.f32 %v301_v34, %v218_v33  ;;  %v303_v36 = vpop.f32.mrb[1].mxu1 }
 0x1d1   :  { %320 = vst.msk [vmem:[#allocation2] sm:$0xff] %vm49_vm0, %v302_v35 }
 0x1d2   :  { %v306_v39 = vpop.f32.mrb[2].mxu1 }
 0x1d3   :  { %v307_v40 = vadd.f32 %v306_v39, %v223_v37  ;;  %v308_v41 = vpop.f32.mrb[3].mxu1 }
 0x1d5   :  { %321 = vst.msk [vmem:[#allocation2 + $0x8] sm:$0xff] %vm49_vm0, %v307_v40 }
 0x1d6   :  { %v311_v42 = vpop.f32.mrb[4].mxu1 }
 0x1d7   :  { %v312_v43 = vadd.f32 %v311_v42, %v228_v38  ;;  %v313_v44 = vpop.f32.mrb[5].mxu1 }
 0x1d9   :  { %322 = vst.msk [vmem:[#allocation2 + $0x10] sm:$0xff] %vm49_vm0, %v312_v43 }
 0x1da   :  { %v316_v46 = vpop.f32.mrb[6].mxu1 }
 0x1db   :  { %v317_v47 = vadd.f32 %v316_v46, %v233_v45  ;;  %v318_v48 = vpop.f32.mrb[7].mxu1 }
 0x1dd   :  { %323 = vst.msk [vmem:[#allocation2 + $0x18] sm:$0xff] %vm49_vm0, %v317_v47 }
 0x1df   :  { %v427_v51 = vpop.f32.mrb[8].mxu1  ;;  %v422_v52 = vpop.f32.mrb[16].mxu0 }
 0x1e0   :  { %v428_v53 = vadd.f32 %v427_v51, %v344_v50  ;;  %v429_v54 = vpop.f32.mrb[9].mxu1  ;;  %v423_v55 = vadd.f32 %v422_v52, %v339_v49  ;;  %v424_v56 = vpop.f32.mrb[17].mxu0 }
 0x1e2   :  { %443 = vst.msk [vmem:[#allocation2 + $0x28] sm:$0xff] %vm49_vm0, %v428_v53  ;;  %442 = vst.msk [vmem:[#allocation2 + $0x20] sm:$0xff] %vm49_vm0, %v423_v55 }
 0x1e3   :  { %v432_v58 = vpop.f32.mrb[10].mxu1 }
 0x1e4   :  { %v433_v59 = vadd.f32 %v432_v58, %v349_v57  ;;  %v434_v60 = vpop.f32.mrb[11].mxu1 }
 0x1e6   :  { %444 = vst.msk [vmem:[#allocation2 + $0x30] sm:$0xff] %vm49_vm0, %v433_v59 }
 0x1e7   :  { %v437_v62 = vpop.f32.mrb[12].mxu1 }
 0x1e8   :  { %v438_v63 = vadd.f32 %v437_v62, %v354_v61  ;;  %v439_v0 = vpop.f32.mrb[13].mxu1 }
 0x1ea   :  { %445 = vst.msk [vmem:[#allocation2 + $0x38] sm:$0xff] %vm49_vm0, %v438_v63 }
 0x1eb   :  { %516 = shalt.err (!%p513_p4)
}
 0x1ec   :  { %s517_s25 = scalar_lea.hbm %s684_s5, 1024 }
 0x1ed   :  { %p518_p5 = scmp.ne.s32.totalorder %s684_s5, %s517_s25  ;;  %p521_p6 = scmp.lt.u32.totalorder %s517_s25, %s684_s5 }
 0x1ef   :  { %p523_p7 = pnand %p521_p6, %p518_p5 }
 0x1f1   :  { %526 = shalt.err (!%p523_p7)
}
 0x1f2   :  { %s532_s0 = smov 128   ;;  %s533_s30 = smov 8  }
 0x1f3   :  { %457 = dma.vmem_to_hbm [thread:$0]  %s452_s21, 1024, %s684_s5, [#allocation3], %s532_s0, %s532_s0, %s533_s30  }
 0x1f4   :  { %527 = dma.done.wait [#allocation3], 1024  }
 0x1f5   :  { %528 = vsyncadd [#allocation3], 4294966272 }
 0x1f6   :  { %461 = vsyncpa [#allocation3], 1 }

</bundles_post_ra>
